<compile_context>
chip_gen: v5e
topology: v5e:2x2
jax: 0.10.0
libtpu: 0.0.40
codegen_flags: <defaults>
</compile_context>

<pallas_src>
import math

import jax
import jax.numpy as jnp
from jax.experimental import pallas as pl
from jax.experimental.pallas import tpu as pltpu


def _round_up(x, m):
    return ((x + m - 1) // m) * m


def _sublane_align(dtype):
    # min second-to-last-dim tile per dtype width: f32 -> 8, bf16 -> 16, i8 -> 32
    return {4: 8, 2: 16, 1: 32}.get(jnp.dtype(dtype).itemsize, 8)


def _vmem_capacity():
    try:
        return int(pltpu.get_tpu_info().vmem_capacity_bytes)
    except Exception:
        return 64 * 1024 * 1024  # conservative default = v7x per-core VMEM


# ----------------------------- kernels --------------------------------------


def _linear_fullk_kernel(x_ref, w_ref, b_ref, o_ref):
    """One (tm, tn) output tile of y = x @ w + b with the full K resident.

    x_ref: (tm, Kp) activation tile (input dtype; cast to MXU dtype here)
    w_ref: (Kp, tn) pre-transposed weight tile (MXU operand dtype)
    b_ref: (1, tn)  bias tile (f32)
    o_ref: (tm, tn) output tile
    """
    w = w_ref[...]
    x = x_ref[...].astype(w.dtype)
    acc = jnp.dot(x, w, preferred_element_type=jnp.float32)
    o_ref[...] = (acc + b_ref[...]).astype(o_ref.dtype)


def _linear_ktiled_kernel(x_ref, w_ref, b_ref, o_ref, acc_ref):
    """K-tiled fallback (very large in_features): f32 accumulator over k."""
    k = pl.program_id(2)

    @pl.when(k == 0)
    def _():
        acc_ref[...] = jnp.zeros_like(acc_ref)

    w = w_ref[...]
    x = x_ref[...].astype(w.dtype)
    acc_ref[...] += jnp.dot(x, w, preferred_element_type=jnp.float32)

    @pl.when(k == pl.num_programs(2) - 1)
    def _():
        o_ref[...] = (acc_ref[...] + b_ref[...]).astype(o_ref.dtype)


# ----------------------------- wrapper ---------------------------------------


def _pallas_linear(x2d, weight, bias, *, operand_dtype=jnp.bfloat16,
                   tm_target=512, tn_target=512, tk_target=1024):
    """y = x2d @ weight.T + bias (PyTorch Linear layout) as a Pallas kernel."""
    M, K = x2d.shape
    N, Kw = weight.shape
    assert K == Kw, (K, Kw)

    out_dtype = x2d.dtype
    x_bytes = jnp.dtype(x2d.dtype).itemsize
    op_dtype = jnp.dtype(operand_dtype)
    if jnp.dtype(x2d.dtype).itemsize < op_dtype.itemsize:
        op_dtype = jnp.dtype(x2d.dtype)      # never upcast the operands
    op_bytes = op_dtype.itemsize
    out_bytes = jnp.dtype(out_dtype).itemsize
    m_align = _sublane_align(x2d.dtype)

    # Pad K (contraction) to a lane multiple only when needed.  This is the
    # only case where the activation is copied in the wrapper.
    Kp = _round_up(K, 128)
    if Kp != K:
        x2d = jnp.pad(x2d, ((0, 0), (0, Kp - K)))

    # One-time (out,in) -> (in,out) transpose + cast of the (small) weight so
    # the kernel runs a plain MK x KN matmul with no per-step transpose.
    w_t = weight.T.astype(op_dtype)
    if Kp != K:
        w_t = jnp.pad(w_t, ((0, Kp - K), (0, 0)))
    b2d = bias.astype(jnp.float32).reshape(1, N)

    vmem_cap = _vmem_capacity()
    budget = max(vmem_cap - 12 * 1024 * 1024, 16 * 1024 * 1024)

    # -------- preferred path: full K resident, no reduction grid axis --------
    tn = N if N <= tn_target else tn_target          # == N or a multiple of 128
    tm = _round_up(min(M, tm_target), m_align)

    def fullk_need(tm_, tn_):
        return (2 * tm_ * Kp * x_bytes        # x blocks (double-buffered)
                + 2 * Kp * tn_ * op_bytes     # weight blocks
                + 2 * tn_ * 4                 # bias blocks
                + 2 * tm_ * tn_ * out_bytes)  # output blocks

    while fullk_need(tm, tn) > budget and tm > m_align:
        tm = max(m_align, _round_up(tm // 2, m_align))
    while fullk_need(tm, tn) > budget and tn > 128:
        tn = max(128, _round_up(tn // 2, 128))

    if fullk_need(tm, tn) <= budget:
        # Expose >= 2 blocks so both v7x TensorCores get work (harmless on 1-TC).
        if pl.cdiv(M, tm) * pl.cdiv(N, tn) == 1 and tm >= 2 * m_align:
            tm = max(m_align, _round_up(pl.cdiv(M, 2), m_align))
        grid_m = pl.cdiv(M, tm)
        grid_n = pl.cdiv(N, tn)

        x_traffic = M * Kp * x_bytes
        w_traffic = Kp * N * op_bytes
        # Keep the operand whose re-streaming would cost more resident across
        # the inner grid axis (its block index then changes only with the
        # outer axis, so it is DMA'd once in total).
        weight_resident = (grid_n - 1) * x_traffic <= (grid_m - 1) * w_traffic
        if weight_resident:
            grid = (grid_n, grid_m)                       # j outer, i inner
            x_spec = pl.BlockSpec((tm, Kp), lambda j, i: (i, 0))
            w_spec = pl.BlockSpec((Kp, tn), lambda j, i: (0, j))
            b_spec = pl.BlockSpec((1, tn), lambda j, i: (0, j))
            o_spec = pl.BlockSpec((tm, tn), lambda j, i: (i, j))
            bytes_accessed = grid_n * x_traffic + w_traffic
        else:
            grid = (grid_m, grid_n)                       # i outer, j inner
            x_spec = pl.BlockSpec((tm, Kp), lambda i, j: (i, 0))
            w_spec = pl.BlockSpec((Kp, tn), lambda i, j: (0, j))
            b_spec = pl.BlockSpec((1, tn), lambda i, j: (0, j))
            o_spec = pl.BlockSpec((tm, tn), lambda i, j: (i, j))
            bytes_accessed = x_traffic + grid_m * w_traffic
        bytes_accessed += M * N * out_bytes + N * 4

        vmem_limit = min(max(vmem_cap - 8 * 1024 * 1024, 24 * 1024 * 1024),
                         max(32 * 1024 * 1024, int(1.5 * fullk_need(tm, tn))))
        cost = pl.CostEstimate(flops=2 * M * N * Kp, transcendentals=0,
                               bytes_accessed=int(bytes_accessed))

        return pl.pallas_call(
            _linear_fullk_kernel,
            out_shape=jax.ShapeDtypeStruct((M, N), out_dtype),
            grid_spec=pltpu.PrefetchScalarGridSpec(
                num_scalar_prefetch=0,
                grid=grid,
                in_specs=[x_spec, w_spec, b_spec],
                out_specs=o_spec,
            ),
            compiler_params=pltpu.CompilerParams(
                dimension_semantics=("parallel", "parallel"),
                vmem_limit_bytes=int(vmem_limit),
            ),
            cost_estimate=cost,
        )(x2d, w_t, b2d)

    # -------- fallback: K-tiled accumulator (huge in_features only) ----------
    tm = _round_up(min(M, 256), m_align)
    tn = N if N <= 256 else 256
    tk = 128
    for cand in (min(tk_target, 2048), 1024, 512, 256, 128):
        if cand <= Kp and Kp % cand == 0:
            tk = cand
            break

    def ktiled_need(tk_):
        return (2 * (tm * tk_ * x_bytes + tk_ * tn * op_bytes
                     + tm * tn * out_bytes) + tm * tn * 4 + 2 * tn * 4)

    while ktiled_need(tk) > budget and tk > 128:
        tk //= 2

    grid = (pl.cdiv(M, tm), pl.cdiv(N, tn), Kp // tk)
    vmem_limit = min(max(vmem_cap - 8 * 1024 * 1024, 24 * 1024 * 1024),
                     max(32 * 1024 * 1024, int(1.5 * ktiled_need(tk))))
    cost = pl.CostEstimate(
        flops=2 * M * N * Kp, transcendentals=0,
        bytes_accessed=int(M * Kp * x_bytes + grid[0] * Kp * N * op_bytes
                           + M * N * out_bytes + N * 4))

    return pl.pallas_call(
        _linear_ktiled_kernel,
        out_shape=jax.ShapeDtypeStruct((M, N), out_dtype),
        grid_spec=pltpu.PrefetchScalarGridSpec(
            num_scalar_prefetch=0,
            grid=grid,
            in_specs=[
                pl.BlockSpec((tm, tk), lambda i, j, k: (i, k)),   # x
                pl.BlockSpec((tk, tn), lambda i, j, k: (k, j)),   # weight (K,N)
                pl.BlockSpec((1, tn), lambda i, j, k: (0, j)),    # bias
            ],
            out_specs=pl.BlockSpec((tm, tn), lambda i, j, k: (i, j)),
            scratch_shapes=[pltpu.VMEM((tm, tn), jnp.float32)],
        ),
        compiler_params=pltpu.CompilerParams(
            dimension_semantics=("parallel", "parallel", "arbitrary"),
            vmem_limit_bytes=int(vmem_limit),
        ),
        cost_estimate=cost,
    )(x2d, w_t, b2d)


# Below ~4 MFLOP the pallas_call launch overhead dominates; a fused XLA dot
# is strictly better there (the demo forces the Pallas path to verify it).
_TINY_FLOPS = 1 << 22


def _linear(x2d, weight, bias, force_pallas=False, **kwargs):
    M, K = x2d.shape
    N = weight.shape[0]
    if not force_pallas and 2 * M * N * K < _TINY_FLOPS:
        op_dtype = jnp.dtype(kwargs.get("operand_dtype", jnp.bfloat16))
        if jnp.dtype(x2d.dtype).itemsize < op_dtype.itemsize:
            op_dtype = jnp.dtype(x2d.dtype)
        y = jax.lax.dot_general(
            x2d.astype(op_dtype), weight.astype(op_dtype),
            (((1,), (1,)), ((), ())), preferred_element_type=jnp.float32)
        return (y + bias.astype(jnp.float32)).astype(x2d.dtype)
    return _pallas_linear(x2d, weight, bias, **kwargs)


def time_distributed_linear(x, weight, bias, batch_first=False,
                            force_pallas=False, **kwargs):
    """Pallas equivalent of TimeDistributed(nn.Linear) forward.

    weight: (out_features, in_features) -- PyTorch Linear convention.
    bias:   (out_features,)
    """
    if x.ndim <= 2:
        x2d = x if x.ndim == 2 else x.reshape(1, -1)
        y = _linear(x2d, weight, bias, force_pallas, **kwargs)
        return y if x.ndim == 2 else y.reshape(-1)

    in_features = x.shape[-1]
    x_reshape = x.reshape(-1, in_features)          # x.contiguous().view(-1, F)
    y = _linear(x_reshape, weight, bias, force_pallas, **kwargs)
    out_features = y.shape[-1]
    if batch_first:
        return y.reshape(x.shape[0], -1, out_features)
    return y.reshape(-1, x.shape[1], out_features)


def init_linear_params(key, in_features, out_features, dtype=jnp.float32):
    """Deterministic init matching nn.Linear's default (kaiming-uniform-ish)."""
    kw, kb = jax.random.split(key)
    bound = 1.0 / math.sqrt(in_features)
    weight = jax.random.uniform(
        kw, (out_features, in_features), dtype, minval=-bound, maxval=bound)
    bias = jax.random.uniform(
        kb, (out_features,), dtype, minval=-bound, maxval=bound)
    return weight, bias


# TODO(synk): TimeDistributed wraps an arbitrary nn.Module; only the nn.Linear
# inner module (the common use in this codebase) is implemented here.

if __name__ == "__main__":
    key = jax.random.PRNGKey(0)
    k_x, k_p, k_x2, k_p2 = jax.random.split(key, 4)

    def ref_linear(x2d, w, b):
        # Same operand rounding as the kernel: bf16 MXU feed, f32 accumulate.
        y = jax.lax.dot_general(
            x2d.astype(jnp.bfloat16), w.astype(jnp.bfloat16),
            (((1,), (1,)), ((), ())), preferred_element_type=jnp.float32)
        return y + b.astype(jnp.float32)

    # Case 1: small (seq, batch, in) layout, batch_first=False -- force the
    # Pallas path so the kernel itself is exercised and verified.
    seq, batch, in_f, out_f = 8, 2, 32, 32
    x = jax.random.normal(k_x, (seq, batch, in_f), dtype=jnp.float32)
    weight, bias = init_linear_params(k_p, in_f, out_f)

    y = time_distributed_linear(x, weight, bias, batch_first=False,
                                force_pallas=True)
    y = jax.block_until_ready(y)
    y_ref = ref_linear(x.reshape(-1, in_f), weight, bias).reshape(-1, batch, out_f)
    assert y.shape == (seq, batch, out_f), y.shape
    assert jnp.allclose(y, y_ref, atol=2e-3, rtol=2e-3), \
        float(jnp.max(jnp.abs(y - y_ref)))

    # The tiny-shape XLA dispatch must match the same semantics.
    y_fast = time_distributed_linear(x, weight, bias, batch_first=False)
    y_fast = jax.block_until_ready(y_fast)
    assert jnp.allclose(y_fast, y_ref, atol=2e-3, rtol=2e-3)

    # 2-D input path (module's len(x.size()) <= 2 branch).
    x1 = x.reshape(-1, in_f)[:5]
    y1 = jax.block_until_ready(
        time_distributed_linear(x1, weight, bias, force_pallas=True))
    assert y1.shape == (5, out_f)
    assert jnp.allclose(y1, ref_linear(x1, weight, bias), atol=2e-3, rtol=2e-3)

    # Case 2: batch_first=True with a real contraction (K=1024) fully resident
    # in VMEM, weight-resident grid ordering, no wrapper-side padding.
    seq2, batch2, in_f2, out_f2 = 64, 8, 1024, 384
    x2 = jax.random.normal(k_x2, (seq2, batch2, in_f2), dtype=jnp.float32)
    w2, b2 = init_linear_params(k_p2, in_f2, out_f2)

    y2 = time_distributed_linear(x2, w2, b2, batch_first=True)
    y2 = jax.block_until_ready(y2)
    y2_ref = ref_linear(x2.reshape(-1, in_f2), w2, b2).reshape(seq2, -1, out_f2)
    assert y2.shape == (seq2, batch2, out_f2), y2.shape
    assert jnp.allclose(y2, y2_ref, atol=1e-2, rtol=1e-2), \
        float(jnp.max(jnp.abs(y2 - y2_ref)))

    print("KERNEL_OK")
</pallas_src>

<mosaic_0001>
module attributes {stable_mosaic.version = 11 : i64} {
  func.func @_linear_fullk_kernel(%arg0: i32, %arg1: i32, %arg2: memref<8x128xf32, #tpu.memory_space<vmem>>, %arg3: memref<128x32xbf16, #tpu.memory_space<vmem>>, %arg4: memref<1x32xf32, #tpu.memory_space<vmem>>, %arg5: memref<8x32xf32, #tpu.memory_space<vmem>>) attributes {dimension_semantics = [#tpu.dimension_semantics<parallel>, #tpu.dimension_semantics<parallel>], iteration_bounds = array<i64: 1, 2>, scalar_prefetch = 0 : i64, scratch_operands = 0 : i64, tpu.core_type = #tpu.core_type<tc>, window_params = [{transform_indices = @transform_0, window_bounds = array<i64: 8, 128>}, {transform_indices = @transform_1, window_bounds = array<i64: 128, 32>}, {transform_indices = @transform_2, window_bounds = array<i64: 1, 32>}, {transform_indices = @transform_3, window_bounds = array<i64: 8, 32>}]} {
    %c0 = arith.constant 0 : index
    %c0_0 = arith.constant 0 : index
    %0 = vector.load %arg3[%c0, %c0_0] : memref<128x32xbf16, #tpu.memory_space<vmem>>, vector<128x32xbf16>
    %c0_1 = arith.constant 0 : index
    %c0_2 = arith.constant 0 : index
    %1 = vector.load %arg2[%c0_1, %c0_2] : memref<8x128xf32, #tpu.memory_space<vmem>>, vector<8x128xf32>
    %2 = arith.truncf %1 : vector<8x128xf32> to vector<8x128xbf16>
    %cst = arith.constant dense<0.000000e+00> : vector<8x32xf32>
    %3 = tpu.matmul %2, %0, %cst {dimension_numbers = #tpu.dot_dimension_numbers<[1], [0], [0], [1], [0, 0, 1, 1], [], []>} : vector<8x128xbf16>, vector<128x32xbf16>, vector<8x32xf32> -> vector<8x32xf32>
    %c0_3 = arith.constant 0 : index
    %c0_4 = arith.constant 0 : index
    %4 = vector.load %arg4[%c0_3, %c0_4] : memref<1x32xf32, #tpu.memory_space<vmem>>, vector<1x32xf32>
    %5 = vector.broadcast %4 : vector<1x32xf32> to vector<8x32xf32>
    %6 = arith.addf %3, %5 : vector<8x32xf32>
    %c0_5 = arith.constant 0 : index
    %c0_6 = arith.constant 0 : index
    %7 = vector.load %arg5[%c0_5, %c0_6] : memref<8x32xf32, #tpu.memory_space<vmem>>, vector<8x32xf32>
    tpu.vector_store %arg5[%c0_5, %c0_6], %6 {strides = array<i32>} : memref<8x32xf32, #tpu.memory_space<vmem>>, vector<8x32xf32>,
    return
  }
  func.func @transform_0(%arg0: i32, %arg1: i32) -> (i32, i32) {
    %c0_i32 = arith.constant 0 : i32
    %c0_i32_0 = arith.constant 0 : i32
    return %arg1, %c0_i32 : i32, i32
  }
  func.func @transform_1(%arg0: i32, %arg1: i32) -> (i32, i32) {
    %c0_i32 = arith.constant 0 : i32
    %c0_i32_0 = arith.constant 0 : i32
    return %c0_i32, %arg0 : i32, i32
  }
  func.func @transform_2(%arg0: i32, %arg1: i32) -> (i32, i32) {
    %c0_i32 = arith.constant 0 : i32
    %c0_i32_0 = arith.constant 0 : i32
    return %c0_i32, %arg0 : i32, i32
  }
  func.func @transform_3(%arg0: i32, %arg1: i32) -> (i32, i32) {
    %c0_i32 = arith.constant 0 : i32
    return %arg1, %arg0 : i32, i32
  }
}

</mosaic_0001>

<bundles_post_ra>
// kernel: tpu_custom_call.1
= control target key start
LH: loop header
LB: loop body
LE: loop exit
PB: predicated region body
PF: predicated region fallthrough
CT: control target
= control target key end

     0   :  { %8 = vsyncpa [#allocation3], 0  ;;  %s741_s0 = inlined_call_operand.vmem [shape: f32[16,128], index: 0, kind: input, shape index: {}]   ;;  %s742_s1 = inlined_call_operand.vmem [shape: bf16[128,32], index: 1, kind: input, shape index: {}]   ;;  %s743_s2 = inlined_call_operand.vmem [shape: f32[1,32], index: 2, kind: input, shape index: {}]   ;;  %s744_s3 = inlined_call_operand.hbm [shape: f32[16,32], index: 3, kind: output, shape index: {}]  }
   0x1   :  { %10 = vsyncpa [#allocation3 + $0x1], 0  ;;  %s617_s12 = smov 0   ;;  %s619_s13 = smov 0  }
   0x2   :  { %s621_s14 = smov 0   ;;  %s623_s15 = smov 0  }
   0x3   :  { %s625_s16 = smov 0   ;;  %s627_s17 = smov 0  }
   0x4 LB: > { %s408_s18 = sadd.s32 4294967295, %s595_s17   ;;  %s409_s19 = sadd.s32 4294967294, %s595_s17   ;;  %s595_s17 = sphi %s627_s17, %s16_s17   ;;  %s591_s16 = sphi %s625_s16, %s751_s16   ;;  %s587_s15 = sphi %s623_s15, %s750_s15   ;;  %s583_s14 = sphi %s621_s14, %s749_s14   ;;  %s579_s13 = sphi %s619_s13, %s748_s13   ;;  %s575_s12 = sphi %s617_s12, %s747_s12  }
   0x5   : > { %s25_s20 = sadd.s32 1, %s591_s16  ;;  %s115_s21 = sadd.s32 1, %s583_s14 }
   0x6   : > { %p26_p0 = scmp.ge.s32.totalorder %s25_s20, 2  ;;  %p125_p1 = scmp.ne.s32.totalorder %s583_s14, %s579_s13 }
   0x7   : > { %p126_p2 = scmp.eq.s32.totalorder %s408_s18, 1  ;;  %p131_p3 = scmp.ne.s32.totalorder %s579_s13, %s575_s12 }
   0x8   : > { %s753_s20 = smov (%p26_p0, %s25_s20), 0  ;;  %p132_p5 = scmp.eq.s32.totalorder %s409_s19, 1 }
   0x9   : > { %p657_p4 = por %p126_p2, %p125_p1  ;;  %s110_s23 = ssub.s32 %s591_s16, %s753_s20 }
   0xa   : > { %p414_p6 = scmp.ge.s32.totalorder %s595_s17, 1  ;;  %p113_p7 = scmp.eq.s32.totalorder %s110_s23, 0 }
   0xb   : > { %p664_p8 = por %p132_p5, %p131_p3  ;;  %p170_p9 = scmp.lt.s32.totalorder %s595_s17, 3 }
   0xc   : > { %s670_s25 = scalar_select %p113_p7, %s583_s14, %s115_s21  }
   0xd   : > { %p171_p10 = pnand %p414_p6, %p170_p9 }
   0xe   : > { %p200_p11 = scmp.lt.s32.totalorder (!%p171_p10), %s587_s15, 1  ;;  %s197_s30 = sand.u32 (!%p171_p10), 1, %s579_s13  }
   0xf   : > { %174 = sbr.rel (%p171_p10) target bundleno = 186 (0xba), region = 32  ;;  %s450_s4 = sshll.u32 (!%p171_p10), %s587_s15, 3 }
  0x10   : > { %s415_s5 = sshll.u32 (!%p171_p10), %s197_s30, 3  ;;  %s308_s8 = scalar_lea.hbm (!%p171_p10), %s744_s3, %s450_s4 }
  0x11   : > { %s199_s11 = scalar_lea.vmem (!%p171_p10), [#allocation2], %s415_s5  ;;  %s312_s19 = sshll.u32 (!%p171_p10), %s308_s8, 4  ;;  %s313_s19 = int_to_ptr.hbm [resolvable:$true] %s312_s19 }
  0x12   : > { %s531_s21 = sshra.s32 (!%p171_p10), %s313_s19, 4  ;;  %s537_s28 = scalar_lea.hbm (!%p171_p10), %s744_s3, 16  ;;  %s532_s21 = int_to_ptr.hbm [resolvable:$true] %s531_s21 }
  0x13   : > { %s533_s23 = scalar_lea.hbm (!%p171_p10), %s532_s21, 8  ;;  %p538_p1 = scmp.lt.s32.totalorder (!%p171_p10), %s532_s21, %s744_s3 }
  0x14   : > { %v460_v0 = vld [vmem:[%s742_s1 + $0x38] sm:$0xff]  ;;  %v459_v1 = vld [vmem:[%s742_s1 + $0x30] sm:$0xff]  ;;  %v458_v2 = vld [vmem:[%s742_s1 + $0x28] sm:$0xff]  ;;  %s201_s9 = scalar_select %p200_p11, %s587_s15, 1  ;;  %vm294_vm0 = vcmask 261120  }
  0x15   : > { %281 = vmatpush.bf16.msra.mxu0 %v460_v0  ;;  %v457_v3 = vld [vmem:[%s742_s1 + $0x20] sm:$0xff]  ;;  %v456_v4 = vld [vmem:[%s742_s1 + $0x18] sm:$0xff]  ;;  %v455_v5 = vld [vmem:[%s742_s1 + $0x10] sm:$0xff]  ;;  %s297_s15 = scalar_lea.sflag [#allocation3], %s197_s30  ;;  %p534_p12 = scmp.ne.s32.totalorder %s532_s21, %s533_s23 }
  0x16   : > { %s416_s18 = sshll.u32 %s201_s9, 3  ;;  %v454_v6 = vld [vmem:[%s742_s1 + $0x8] sm:$0xff]  ;;  %v453_v7 = vld [vmem:[%s742_s1] sm:$0xff]  ;;  %p539_p2 = scmp.lt.s32.totalorder %s537_s28, %s533_s23 }
  0x17   : > { %s203_s27 = scalar_lea.vmem %s741_s0, %s416_s18  ;;  %v516_v10 = vld [vmem:[%s743_s2] ss:$0 sm:$0xff]  ;;  %s310_s18 = sshll.u32 %s199_s11, 4  ;;  %s311_s18 = int_to_ptr.vmem [resolvable:$true] %s310_s18 }
  0x18   : > { %v227_v8 = vld [vmem:[%s203_s27] sm:$0xff]  ;;  %p535_p13 = pnand %p534_p12, %p657_p4  ;;  %p540_p3 = por %p539_p2, %p538_p1 }
  0x19   : > { %282 = vmatpush.bf16.msra.mxu0 %v459_v1  ;;  %v228_v9 = vpack.c.bf16 %v227_v8, %v227_v8 }
  0x1a   : > { %p536_p0 = pneg %p535_p13 }
  0x1c   : > { %p541_p5 = pnand %p540_p3, %p536_p0 }
  0x1d   : > { %283 = vmatpush.bf16.msra.mxu0 %v458_v2 }
  0x21   : > { %284 = vmatpush.bf16.msra.mxu0 %v457_v3 }
  0x25   : > { %285 = vmatpush.bf16.msra.mxu0 %v456_v4 }
  0x29   : > { %286 = vmatpush.bf16.msra.mxu0 %v455_v5 }
  0x2d   : > { %287 = vmatpush.bf16.msra.mxu0 %v454_v6 }
  0x31   : > { %288 = vmatpush.bf16.msra.mxu0 %v453_v7 }
  0x34   : > { %289 = vmatmul.bf16.vlgmr.msra.gmra.mxu0 %v228_v9 }
  0xb1   : > { %v290_v11 = vpop.f32.mrf.mxu0 }
  0xb2   : > { %v291_v12 = vadd.f32 %v516_v10, %v290_v11 }
  0xb4   : > { %295 = vst.msk [vmem:[%s199_s11] sm:$0xff] %vm294_vm0, %v291_v12 }
  0xb5   : > { %544 = shalt.err (!%p541_p5)
}
  0xb6   : > { %461 = dma.vmem_to_hbm [thread:$0]  (%p657_p4), %s311_s18, 128, %s313_s19, %s297_s15  }
  0xb9   : > { %v292_v13 = vpop.f32.mrf.mxu0 }
  0xba PF: > { %p467_p6 = scmp.ge.s32.totalorder %s595_s17, 2  ;;  %s324_s30 = sand.u32 1, %s575_s12  }
  0xbb   : > { %s325_s5 = scalar_lea.sflag [#allocation3], %s324_s30 }
  0xbc   : > { %p464_p7 = pnand %p467_p6, %p664_p8 }
  0xbe   : > { %p465_p9 = pneg %p464_p7 }
  0xc0   : > { %570 = dma.done.wait (%p465_p9), %s325_s5, 128  }
  0xc1   : > { %572 = vsyncadd (%p465_p9), %s325_s5, 4294967168  ;;  %s16_s17 = sadd.s32 1, %s595_s17   ;;  %s747_s12 = smov %s579_s13 }
  0xc2   : > { %p13_p10 = scmp.ge.s32.totalorder %s16_s17, 4   ;;  %s748_s13 = smov %s583_s14 }
  0xc3   : > { %s749_s14 = smov %s670_s25  ;;  %s750_s15 = smov %s591_s16 }
  0xc4   : > { %s751_s16 = smov %s753_s20  ;;  %15 = sbr.rel (!%p13_p10) target bundleno = 4 (0x4), region = 73 }
  0xc9   :  { %331 = vsyncpa [#allocation3], 1 }
  0xca   :  { %333 = vsyncpa [#allocation3 + $0x1], 1 }

</bundles_post_ra>
